<compile_context>
chip_gen: v7x
topology: tpu7x:2x2x1
jax: 0.10.0
libtpu: 0.0.40
codegen_flags: <defaults>
</compile_context>

<pallas_src>
import jax
import jax.numpy as jnp
from jax.experimental import pallas as pl
from jax.experimental.pallas import tpu as pltpu

_TARGET_TILE_BYTES = 4 << 20  # fallback copy only: ~4 MiB blocks


# ---------------------------------------------------------------------------
# Main path: zero-traffic identity (no DMA, no vector work).
# ---------------------------------------------------------------------------
def _identity_noop_kernel(x_ref, o_ref):
    # The output HBM buffer aliases the input buffer, so the values are
    # already in place.  pltpu.touch pins a fake read+write dependency on the
    # aliased output so it is considered produced; nothing is moved.
    del x_ref
    pltpu.touch(o_ref)


def _identity_noop(x: jax.Array) -> jax.Array:
    return pl.pallas_call(
        _identity_noop_kernel,
        out_shape=jax.ShapeDtypeStruct(x.shape, x.dtype),
        in_specs=[pl.BlockSpec(memory_space=pl.ANY)],   # raw HBM ref, no auto-DMA
        out_specs=pl.BlockSpec(memory_space=pl.ANY),
        input_output_aliases={0: 0},                    # output buffer == input buffer
    )(x)


# ---------------------------------------------------------------------------
# Fallback: real tiled copy (used only if the no-op path fails to lower).
# ---------------------------------------------------------------------------
def _copy_kernel(x_ref, o_ref):
    o_ref[...] = x_ref[...]


def _tiled_copy_2d(x2d: jax.Array, tile_r: int, tile_c: int) -> jax.Array:
    rows, cols = x2d.shape
    itemsize = jnp.dtype(x2d.dtype).itemsize
    tile_bytes = tile_r * tile_c * itemsize
    # Cover in+out double buffering (4 x tile) plus headroom, bounded so it
    # fits v7x's 64 MiB physical VMEM as well as v5e/v6e's 128 MiB.
    vmem_limit = int(min(56 << 20, max(32 << 20, 4 * tile_bytes + (4 << 20))))
    return pl.pallas_call(
        _copy_kernel,
        out_shape=jax.ShapeDtypeStruct((rows, cols), x2d.dtype),
        grid=(pl.cdiv(rows, tile_r), pl.cdiv(cols, tile_c)),
        in_specs=[pl.BlockSpec((tile_r, tile_c), lambda i, j: (i, j))],
        out_specs=pl.BlockSpec((tile_r, tile_c), lambda i, j: (i, j)),
        compiler_params=pltpu.CompilerParams(
            dimension_semantics=("parallel", "parallel"),
            vmem_limit_bytes=vmem_limit,
        ),
    )(x2d)


def _fallback_copy(x: jax.Array) -> jax.Array:
    total = x.size
    itemsize = jnp.dtype(x.dtype).itemsize
    sublane = 8 * max(1, 4 // itemsize)  # row granularity: 8 f32 / 16 bf16 / 32 int8

    # Prefer a lane-dense (rows, lanes) view with the widest trailing dim that
    # divides the element count: long unmasked stores, few long DMAs.
    lanes = next((l for l in (8192, 4096, 2048, 1024, 512, 256, 128)
                  if total % l == 0), None)
    if lanes is not None:
        x2d = x.reshape(total // lanes, lanes)
    elif x.ndim >= 2:
        x2d = x.reshape(x.shape[0], -1)
    else:
        x2d = x.reshape(1, total)

    rows, cols = x2d.shape
    # Column tile: full extent when small (always legal), otherwise a
    # 128-multiple so even a (1, huge) ragged view can never exceed VMEM.
    tile_c = cols if cols <= 8192 else 8192
    row_budget = max(sublane,
                     (_TARGET_TILE_BYTES // max(tile_c * itemsize, 1))
                     // sublane * sublane)
    tile_r = rows if rows <= row_budget else row_budget
    out2d = _tiled_copy_2d(x2d, tile_r, tile_c)
    return out2d.reshape(x.shape)


# ---------------------------------------------------------------------------
# Public wrapper (argument-insensitive, like nn.Identity).
# ---------------------------------------------------------------------------
def identity(x: jax.Array, *args, **kwargs) -> jax.Array:
    """Argument-insensitive identity; same shape, dtype and values as input."""
    del args, kwargs  # like nn.Identity, extra args are ignored
    if x.ndim == 0 or x.size == 0:
        return x  # degenerate cases: nothing to do
    try:
        return _identity_noop(x)
    except Exception:
        # Defensive: if the no-op/alias path cannot lower on some backend,
        # fall back to a real (bandwidth-bound) tiled copy.
        return _fallback_copy(x)


if __name__ == "__main__":
    key = jax.random.PRNGKey(0)
    # Shape consistent with a typical ReferenceNet feature map: (N, C, H, W)
    x = jax.random.normal(key, (2, 4, 16, 16), dtype=jnp.float32)

    y = identity(x)
    jax.block_until_ready(y)

    assert y.shape == x.shape, f"shape mismatch: {y.shape} vs {x.shape}"
    assert y.dtype == x.dtype, f"dtype mismatch: {y.dtype} vs {x.dtype}"
    assert bool(jnp.all(y == x)), "identity output differs from input"

    print("KERNEL_OK")
</pallas_src>

<mosaic_0001>
module attributes {stable_mosaic.version = 11 : i64} {
  func.func @_identity_noop_kernel(%arg0: memref<2x4x16x16xf32, #tpu.memory_space<any>>, %arg1: memref<2x4x16x16xf32, #tpu.memory_space<any>>) attributes {dimension_semantics = [], scalar_prefetch = 0 : i64, scratch_operands = 0 : i64, tpu.core_type = #tpu.core_type<tc>} {
    return
  }
}

module attributes {stable_mosaic.version = 11 : i64} {
  func.func @_copy_kernel(%arg0: i32, %arg1: i32, %arg2: memref<1x2048xf32, #tpu.memory_space<vmem>>, %arg3: memref<1x2048xf32, #tpu.memory_space<vmem>>) attributes {dimension_semantics = [#tpu.dimension_semantics<parallel>, #tpu.dimension_semantics<parallel>], iteration_bounds = array<i64: 1, 1>, scalar_prefetch = 0 : i64, scratch_operands = 0 : i64, tpu.core_type = #tpu.core_type<tc>, window_params = [{transform_indices = @transform_0, window_bounds = array<i64: 1, 2048>}, {transform_indices = @transform_1, window_bounds = array<i64: 1, 2048>}]} {
    %c0 = arith.constant 0 : index
    %c0_0 = arith.constant 0 : index
    %0 = vector.load %arg2[%c0, %c0_0] : memref<1x2048xf32, #tpu.memory_space<vmem>>, vector<1x2048xf32>
    %c0_1 = arith.constant 0 : index
    %c0_2 = arith.constant 0 : index
    %1 = vector.load %arg3[%c0_1, %c0_2] : memref<1x2048xf32, #tpu.memory_space<vmem>>, vector<1x2048xf32>
    tpu.vector_store %arg3[%c0_1, %c0_2], %0 {strides = array<i32>} : memref<1x2048xf32, #tpu.memory_space<vmem>>, vector<1x2048xf32>,
    return
  }
  func.func @transform_0(%arg0: i32, %arg1: i32) -> (i32, i32) {
    %c0_i32 = arith.constant 0 : i32
    return %arg0, %arg1 : i32, i32
  }
  func.func @transform_1(%arg0: i32, %arg1: i32) -> (i32, i32) {
    %c0_i32 = arith.constant 0 : i32
    return %arg0, %arg1 : i32, i32
  }
}

</mosaic_0001>

<bundles_post_ra>
// kernel: tpu_custom_call.1
= control target key start
LH: loop header
LB: loop body
LE: loop exit
PB: predicated region body
PF: predicated region fallthrough
CT: control target
= control target key end

     0   :  { %s16_s0 = inlined_call_operand.hbm [shape: f32[2,4,16,16], index: 0, kind: input, shape index: {}, may-alias: {0,1}]   ;;  %s17_s1 = inlined_call_operand.hbm [shape: f32[2,4,16,16], index: 1, kind: output, shape index: {}, may-alias: {0,1}]  }

// kernel: tpu_custom_call.1
= control target key start
LH: loop header
LB: loop body
LE: loop exit
PB: predicated region body
PF: predicated region fallthrough
CT: control target
= control target key end

     0   :  { %6 = vsyncpa [#allocation3], 0  ;;  %s126_s0 = inlined_call_operand.hbm [shape: f32[1,2048], index: 0, kind: input, shape index: {}]   ;;  %s127_s1 = inlined_call_operand.hbm [shape: f32[1,2048], index: 1, kind: output, shape index: {}]  }
   0x1   :  { %7 = vsyncpa [#allocation4], 0  ;;  %s90_s6 = smov [#allocation2]   ;;  %s42_s10 = scalar_lea.hbm %s126_s0, 256 }
   0x2   :  { %s14_s7 = sshll.u32 %s90_s6, 4  ;;  %p43_p0 = scmp.ne.s32.totalorder %s126_s0, %s42_s10  ;;  %s15_s7 = int_to_ptr.vmem [resolvable:$true] %s14_s7 }
   0x3   :  { %p46_p1 = scmp.lt.u32.totalorder %s42_s10, %s126_s0 }
   0x5   :  { %p48_p2 = pnand %p46_p1, %p43_p0 }
   0x7   :  { %51 = shalt.err (!%p48_p2)
}
   0x8   :  { %s52_s15 = scalar_lea.vmem %s15_s7, 256  ;;  %p57_p4 = scmp.lt.s32.totalorder %s15_s7, %s15_s7 }
   0x9   :  { %p53_p3 = scmp.ne.s32.totalorder %s15_s7, %s52_s15  ;;  %p58_p5 = scmp.lt.s32.totalorder %s52_s15, %s52_s15 }
   0xb   :  { %p59_p6 = por %p58_p5, %p57_p4 }
   0xd   :  { %p60_p7 = pnand %p59_p6, %p53_p3 }
   0xf   :  { %63 = shalt.err (!%p60_p7)
}
  0x10   :  { %17 = dma.hbm_to_vmem [thread:$0]  %s126_s0, 256, %s15_s7, [#allocation3]  }
  0x11   :  { %86 = dma.done.wait [#allocation3], 256  }
  0x12   :  { %87 = vsyncadd [#allocation3], 4294967040  ;;  %s91_s18 = smov [#allocation5]   ;;  %v21_v0 = vld [vmem:[#allocation2] sm:$0xff]  ;;  %v22_v1 = vld [vmem:[#allocation2 + $0x8] sm:$0xff] }
  0x13   :  { %s31_s19 = sshll.u32 %s91_s18, 4  ;;  %23 = vst [vmem:[#allocation5] sm:$0xff] %v21_v0  ;;  %24 = vst [vmem:[#allocation5 + $0x8] sm:$0xff] %v22_v1  ;;  %s32_s19 = int_to_ptr.vmem [resolvable:$true] %s31_s19 }
  0x14   :  { %s64_s20 = scalar_lea.vmem %s32_s19, 256  ;;  %p69_p9 = scmp.lt.s32.totalorder %s32_s19, %s32_s19 }
  0x15   :  { %p65_p8 = scmp.ne.s32.totalorder %s32_s19, %s64_s20  ;;  %p70_p10 = scmp.lt.s32.totalorder %s64_s20, %s64_s20 }
  0x17   :  { %p71_p11 = por %p70_p10, %p69_p9 }
  0x19   :  { %p72_p12 = pnand %p71_p11, %p65_p8 }
  0x1b   :  { %75 = shalt.err (!%p72_p12)
}
  0x1c   :  { %s76_s0 = scalar_lea.hbm %s127_s1, 256 }
  0x1d   :  { %p77_p13 = scmp.ne.s32.totalorder %s127_s1, %s76_s0  ;;  %p80_p0 = scmp.lt.u32.totalorder %s76_s0, %s127_s1 }
  0x1f   :  { %p82_p1 = pnand %p80_p0, %p77_p13 }
  0x21   :  { %85 = shalt.err (!%p82_p1)
}
  0x22   :  { %34 = dma.vmem_to_hbm [thread:$0]  %s32_s19, 256, %s127_s1, [#allocation4]  }
  0x23   :  { %88 = dma.done.wait [#allocation4], 256  }
  0x24   :  { %89 = vsyncadd [#allocation4], 4294967040 }
  0x25   :  { %38 = vsyncpa [#allocation3], 1 }
  0x26   :  { %39 = vsyncpa [#allocation4], 1 }

</bundles_post_ra>
